<compile_context>
chip_gen: v5e
topology: v5e:2x2
jax: 0.10.0
libtpu: 0.0.40
codegen_flags: <defaults>
</compile_context>

<pallas_src>
import jax
import jax.numpy as jnp
from jax.experimental import pallas as pl
from jax.experimental.pallas import tpu as pltpu

_EPS = 1e-6


def _segment_allsum(v, seg):
    """Exact sum-all-reduce within aligned power-of-two lane segments.

    After log2(seg) roll/select/add steps every lane holds the sum of its own
    `seg`-wide, `seg`-aligned lane segment.  Rolls go to the XLU (separate
    issue slot), so this is nearly free in a memory-bound kernel.
    """
    if seg <= 1:
        return v
    width = v.shape[-1]
    axis = v.ndim - 1
    lane = jax.lax.broadcasted_iota(jnp.int32, v.shape, axis)
    sh = 1
    while sh < seg:
        down = pltpu.roll(v, width - sh, axis=axis)  # v[..., lane + sh]
        up = pltpu.roll(v, sh, axis=axis)            # v[..., lane - sh]
        v = v + jnp.where((lane & sh) == 0, down, up)
        sh *= 2
    return v


def _make_kernel(feat, groups):
    n = feat
    inv_n = 1.0 / n
    inv_nm1 = (1.0 / (n - 1)) if n > 1 else float("nan")  # n==1 -> NaN (torch)

    def kernel(x_ref, o_ref):
        xf = x_ref[...].astype(jnp.float32)

        # One-pass moments: both reductions are independent (keeps XLU busy).
        if groups == 1:
            s1 = jnp.sum(xf, axis=-1, keepdims=True)
            s2 = jnp.sum(xf * xf, axis=-1, keepdims=True)
        else:
            # Packed layout: each kernel row holds `groups` logical rows of
            # width `feat`; butterfly gives per-segment sums in every lane.
            s1 = _segment_allsum(xf, feat)
            s2 = _segment_allsum(xf * xf, feat)

        mean = s1 * jnp.float32(inv_n)
        # Bessel-corrected variance: (sum x^2 - n*mean^2) / (n-1)
        var = jnp.maximum(s2 - jnp.float32(n) * mean * mean, 0.0) * jnp.float32(inv_nm1)
        denom = jnp.sqrt(var) + jnp.float32(_EPS)

        # approx reciprocal -> EUP (free slot); two Newton steps restore ~f32
        # accuracy; hot path becomes a single multiply per element.
        r = pl.reciprocal(denom, approx=True)
        r = r * (2.0 - denom * r)
        r = r * (2.0 - denom * r)

        o_ref[...] = ((xf - mean) * r).astype(o_ref.dtype)

    return kernel


def _vmem_budget():
    """Per-generation VMEM budgeting (block budget, scoped vmem limit)."""
    try:
        cap = int(pltpu.get_tpu_info().vmem_capacity_bytes)
    except Exception:
        cap = 64 * 1024 * 1024  # conservative: v7x per-TensorCore VMEM
    budget = min(cap // 3, 24 * 1024 * 1024)
    vmem_limit = int(min(max(2 * budget, 32 * 1024 * 1024), cap // 2))
    return budget, vmem_limit


def _pick_row_tile(rows, width, itemsize, budget_bytes):
    # sublane packing granule for the input dtype (f32: 8, bf16: 16, int8: 32)
    granule = {1: 32, 2: 16}.get(itemsize, 8)
    if rows <= granule:
        return rows  # single full-extent block (allowed: equals array dim)
    # per tile-row VMEM: double-buffered in+out blocks (input dtype) plus ~6
    # f32 temporaries of the in-kernel working set.
    per_row = width * (4 * itemsize + 24)
    tm = max(granule, min(int(budget_bytes // per_row), 4096))
    tm -= tm % granule
    # keep >= 2 grid steps when possible: double-buffered pipelining and both
    # v7x TensorCores via the "parallel" axis.
    while tm > granule and tm >= rows:
        half = tm // 2
        tm = max(granule, half - (half % granule))
    return tm


def standardize(x, row_tile=None):
    """Pallas equivalent of Standardize.forward (normalize over last dim)."""
    orig_shape = x.shape
    feat = int(orig_shape[-1])
    rows = 1
    for s in orig_shape[:-1]:
        rows *= int(s)

    # Lane-dense repack: fold G rows of width `feat` into one 128-lane kernel
    # row (contiguous reshape => free).  Fall back to G=1 when it doesn't tile.
    groups = 1
    if feat < 128 and 128 % feat == 0 and rows > 0:
        g = 128 // feat
        while g > 1 and rows % g != 0:
            g //= 2
        groups = g
    width = groups * feat
    krows = rows // groups if groups > 1 else rows

    x2d = x.reshape(krows, width)
    itemsize = jnp.dtype(x.dtype).itemsize

    budget, vmem_limit = _vmem_budget()
    tm = int(row_tile) if row_tile is not None else _pick_row_tile(
        krows, width, itemsize, budget)

    grid = (pl.cdiv(krows, tm),)

    out = pl.pallas_call(
        _make_kernel(feat, groups),
        out_shape=jax.ShapeDtypeStruct((krows, width), x.dtype),
        grid_spec=pl.GridSpec(
            grid=grid,
            in_specs=[pl.BlockSpec((tm, width), lambda i: (i, 0))],
            out_specs=pl.BlockSpec((tm, width), lambda i: (i, 0)),
        ),
        compiler_params=pltpu.CompilerParams(
            dimension_semantics=("parallel",),
            vmem_limit_bytes=vmem_limit,
        ),
    )(x2d)
    return out.reshape(orig_shape)


if __name__ == "__main__":
    key = jax.random.PRNGKey(0)
    # small shapes consistent with the module: (batch=2, seq=8, hidden=32)
    x = jax.random.normal(key, (2, 8, 32), dtype=jnp.float32) * 3.0 + 1.5

    y = jax.block_until_ready(standardize(x))

    # reference check (plain JAX, same semantics as the PyTorch module)
    mean = jnp.mean(x, axis=-1, keepdims=True)
    var = jnp.sum((x - mean) ** 2, axis=-1, keepdims=True) / (x.shape[-1] - 1)
    ref = (x - mean) / (jnp.sqrt(var) + 1e-6)
    assert jnp.allclose(y, ref, atol=1e-5, rtol=1e-5), "mismatch vs reference"

    # also exercise the non-packed fallback path (feat not a divisor of 128)
    x2 = jax.random.normal(key, (4, 6, 200), dtype=jnp.float32) * 2.0 - 0.5
    y2 = jax.block_until_ready(standardize(x2))
    m2 = jnp.mean(x2, axis=-1, keepdims=True)
    v2 = jnp.sum((x2 - m2) ** 2, axis=-1, keepdims=True) / (x2.shape[-1] - 1)
    ref2 = (x2 - m2) / (jnp.sqrt(v2) + 1e-6)
    assert jnp.allclose(y2, ref2, atol=1e-5, rtol=1e-5), "mismatch (fallback)"

    print("KERNEL_OK")
</pallas_src>

<mosaic_0001>
module attributes {stable_mosaic.version = 11 : i64} {
  func.func @kernel(%arg0: i32, %arg1: memref<4x128xf32, #tpu.memory_space<vmem>>, %arg2: memref<4x128xf32, #tpu.memory_space<vmem>>) attributes {dimension_semantics = [#tpu.dimension_semantics<parallel>], iteration_bounds = array<i64: 1>, scalar_prefetch = 0 : i64, scratch_operands = 0 : i64, tpu.core_type = #tpu.core_type<tc>, window_params = [{transform_indices = @transform_0, window_bounds = array<i64: 4, 128>}, {transform_indices = @transform_1, window_bounds = array<i64: 4, 128>}]} {
    %c0 = arith.constant 0 : index
    %c0_0 = arith.constant 0 : index
    %0 = vector.load %arg1[%c0, %c0_0] : memref<4x128xf32, #tpu.memory_space<vmem>>, vector<4x128xf32>
    %1 = tpu.iota {dimensions = array<i32: 1>} : vector<4x128xi32>
    %c127_i32 = arith.constant 127 : i32
    %2 = tpu.dynamic_rotate %0 by %c127_i32 dim 1 : vector<4x128xf32>, i32 -> vector<4x128xf32>
    %c1_i32 = arith.constant 1 : i32
    %3 = tpu.dynamic_rotate %0 by %c1_i32 dim 1 : vector<4x128xf32>, i32 -> vector<4x128xf32>
    %c1_i32_1 = arith.constant 1 : i32
    %4 = vector.broadcast %c1_i32_1 : i32 to vector<4x128xi32>
    %5 = arith.andi %1, %4 : vector<4x128xi32>
    %c0_i32 = arith.constant 0 : i32
    %6 = vector.broadcast %c0_i32 : i32 to vector<4x128xi32>
    %7 = arith.cmpi eq, %5, %6 : vector<4x128xi32>
    %8 = arith.select %7, %2, %3 : vector<4x128xi1>, vector<4x128xf32>
    %9 = arith.addf %0, %8 : vector<4x128xf32>
    %c126_i32 = arith.constant 126 : i32
    %10 = tpu.dynamic_rotate %9 by %c126_i32 dim 1 : vector<4x128xf32>, i32 -> vector<4x128xf32>
    %c2_i32 = arith.constant 2 : i32
    %11 = tpu.dynamic_rotate %9 by %c2_i32 dim 1 : vector<4x128xf32>, i32 -> vector<4x128xf32>
    %c2_i32_2 = arith.constant 2 : i32
    %12 = vector.broadcast %c2_i32_2 : i32 to vector<4x128xi32>
    %13 = arith.andi %1, %12 : vector<4x128xi32>
    %c0_i32_3 = arith.constant 0 : i32
    %14 = vector.broadcast %c0_i32_3 : i32 to vector<4x128xi32>
    %15 = arith.cmpi eq, %13, %14 : vector<4x128xi32>
    %16 = arith.select %15, %10, %11 : vector<4x128xi1>, vector<4x128xf32>
    %17 = arith.addf %9, %16 : vector<4x128xf32>
    %c124_i32 = arith.constant 124 : i32
    %18 = tpu.dynamic_rotate %17 by %c124_i32 dim 1 : vector<4x128xf32>, i32 -> vector<4x128xf32>
    %c4_i32 = arith.constant 4 : i32
    %19 = tpu.dynamic_rotate %17 by %c4_i32 dim 1 : vector<4x128xf32>, i32 -> vector<4x128xf32>
    %c4_i32_4 = arith.constant 4 : i32
    %20 = vector.broadcast %c4_i32_4 : i32 to vector<4x128xi32>
    %21 = arith.andi %1, %20 : vector<4x128xi32>
    %c0_i32_5 = arith.constant 0 : i32
    %22 = vector.broadcast %c0_i32_5 : i32 to vector<4x128xi32>
    %23 = arith.cmpi eq, %21, %22 : vector<4x128xi32>
    %24 = arith.select %23, %18, %19 : vector<4x128xi1>, vector<4x128xf32>
    %25 = arith.addf %17, %24 : vector<4x128xf32>
    %c120_i32 = arith.constant 120 : i32
    %26 = tpu.dynamic_rotate %25 by %c120_i32 dim 1 : vector<4x128xf32>, i32 -> vector<4x128xf32>
    %c8_i32 = arith.constant 8 : i32
    %27 = tpu.dynamic_rotate %25 by %c8_i32 dim 1 : vector<4x128xf32>, i32 -> vector<4x128xf32>
    %c8_i32_6 = arith.constant 8 : i32
    %28 = vector.broadcast %c8_i32_6 : i32 to vector<4x128xi32>
    %29 = arith.andi %1, %28 : vector<4x128xi32>
    %c0_i32_7 = arith.constant 0 : i32
    %30 = vector.broadcast %c0_i32_7 : i32 to vector<4x128xi32>
    %31 = arith.cmpi eq, %29, %30 : vector<4x128xi32>
    %32 = arith.select %31, %26, %27 : vector<4x128xi1>, vector<4x128xf32>
    %33 = arith.addf %25, %32 : vector<4x128xf32>
    %c112_i32 = arith.constant 112 : i32
    %34 = tpu.dynamic_rotate %33 by %c112_i32 dim 1 : vector<4x128xf32>, i32 -> vector<4x128xf32>
    %c16_i32 = arith.constant 16 : i32
    %35 = tpu.dynamic_rotate %33 by %c16_i32 dim 1 : vector<4x128xf32>, i32 -> vector<4x128xf32>
    %c16_i32_8 = arith.constant 16 : i32
    %36 = vector.broadcast %c16_i32_8 : i32 to vector<4x128xi32>
    %37 = arith.andi %1, %36 : vector<4x128xi32>
    %c0_i32_9 = arith.constant 0 : i32
    %38 = vector.broadcast %c0_i32_9 : i32 to vector<4x128xi32>
    %39 = arith.cmpi eq, %37, %38 : vector<4x128xi32>
    %40 = arith.select %39, %34, %35 : vector<4x128xi1>, vector<4x128xf32>
    %41 = arith.addf %33, %40 : vector<4x128xf32>
    %42 = arith.mulf %0, %0 : vector<4x128xf32>
    %43 = tpu.iota {dimensions = array<i32: 1>} : vector<4x128xi32>
    %c127_i32_10 = arith.constant 127 : i32
    %44 = tpu.dynamic_rotate %42 by %c127_i32_10 dim 1 : vector<4x128xf32>, i32 -> vector<4x128xf32>
    %c1_i32_11 = arith.constant 1 : i32
    %45 = tpu.dynamic_rotate %42 by %c1_i32_11 dim 1 : vector<4x128xf32>, i32 -> vector<4x128xf32>
    %c1_i32_12 = arith.constant 1 : i32
    %46 = vector.broadcast %c1_i32_12 : i32 to vector<4x128xi32>
    %47 = arith.andi %43, %46 : vector<4x128xi32>
    %c0_i32_13 = arith.constant 0 : i32
    %48 = vector.broadcast %c0_i32_13 : i32 to vector<4x128xi32>
    %49 = arith.cmpi eq, %47, %48 : vector<4x128xi32>
    %50 = arith.select %49, %44, %45 : vector<4x128xi1>, vector<4x128xf32>
    %51 = arith.addf %42, %50 : vector<4x128xf32>
    %c126_i32_14 = arith.constant 126 : i32
    %52 = tpu.dynamic_rotate %51 by %c126_i32_14 dim 1 : vector<4x128xf32>, i32 -> vector<4x128xf32>
    %c2_i32_15 = arith.constant 2 : i32
    %53 = tpu.dynamic_rotate %51 by %c2_i32_15 dim 1 : vector<4x128xf32>, i32 -> vector<4x128xf32>
    %c2_i32_16 = arith.constant 2 : i32
    %54 = vector.broadcast %c2_i32_16 : i32 to vector<4x128xi32>
    %55 = arith.andi %43, %54 : vector<4x128xi32>
    %c0_i32_17 = arith.constant 0 : i32
    %56 = vector.broadcast %c0_i32_17 : i32 to vector<4x128xi32>
    %57 = arith.cmpi eq, %55, %56 : vector<4x128xi32>
    %58 = arith.select %57, %52, %53 : vector<4x128xi1>, vector<4x128xf32>
    %59 = arith.addf %51, %58 : vector<4x128xf32>
    %c124_i32_18 = arith.constant 124 : i32
    %60 = tpu.dynamic_rotate %59 by %c124_i32_18 dim 1 : vector<4x128xf32>, i32 -> vector<4x128xf32>
    %c4_i32_19 = arith.constant 4 : i32
    %61 = tpu.dynamic_rotate %59 by %c4_i32_19 dim 1 : vector<4x128xf32>, i32 -> vector<4x128xf32>
    %c4_i32_20 = arith.constant 4 : i32
    %62 = vector.broadcast %c4_i32_20 : i32 to vector<4x128xi32>
    %63 = arith.andi %43, %62 : vector<4x128xi32>
    %c0_i32_21 = arith.constant 0 : i32
    %64 = vector.broadcast %c0_i32_21 : i32 to vector<4x128xi32>
    %65 = arith.cmpi eq, %63, %64 : vector<4x128xi32>
    %66 = arith.select %65, %60, %61 : vector<4x128xi1>, vector<4x128xf32>
    %67 = arith.addf %59, %66 : vector<4x128xf32>
    %c120_i32_22 = arith.constant 120 : i32
    %68 = tpu.dynamic_rotate %67 by %c120_i32_22 dim 1 : vector<4x128xf32>, i32 -> vector<4x128xf32>
    %c8_i32_23 = arith.constant 8 : i32
    %69 = tpu.dynamic_rotate %67 by %c8_i32_23 dim 1 : vector<4x128xf32>, i32 -> vector<4x128xf32>
    %c8_i32_24 = arith.constant 8 : i32
    %70 = vector.broadcast %c8_i32_24 : i32 to vector<4x128xi32>
    %71 = arith.andi %43, %70 : vector<4x128xi32>
    %c0_i32_25 = arith.constant 0 : i32
    %72 = vector.broadcast %c0_i32_25 : i32 to vector<4x128xi32>
    %73 = arith.cmpi eq, %71, %72 : vector<4x128xi32>
    %74 = arith.select %73, %68, %69 : vector<4x128xi1>, vector<4x128xf32>
    %75 = arith.addf %67, %74 : vector<4x128xf32>
    %c112_i32_26 = arith.constant 112 : i32
    %76 = tpu.dynamic_rotate %75 by %c112_i32_26 dim 1 : vector<4x128xf32>, i32 -> vector<4x128xf32>
    %c16_i32_27 = arith.constant 16 : i32
    %77 = tpu.dynamic_rotate %75 by %c16_i32_27 dim 1 : vector<4x128xf32>, i32 -> vector<4x128xf32>
    %c16_i32_28 = arith.constant 16 : i32
    %78 = vector.broadcast %c16_i32_28 : i32 to vector<4x128xi32>
    %79 = arith.andi %43, %78 : vector<4x128xi32>
    %c0_i32_29 = arith.constant 0 : i32
    %80 = vector.broadcast %c0_i32_29 : i32 to vector<4x128xi32>
    %81 = arith.cmpi eq, %79, %80 : vector<4x128xi32>
    %82 = arith.select %81, %76, %77 : vector<4x128xi1>, vector<4x128xf32>
    %83 = arith.addf %75, %82 : vector<4x128xf32>
    %cst = arith.constant 3.125000e-02 : f32
    %84 = vector.broadcast %cst : f32 to vector<4x128xf32>
    %85 = arith.mulf %41, %84 : vector<4x128xf32>
    %cst_30 = arith.constant 3.200000e+01 : f32
    %86 = vector.broadcast %cst_30 : f32 to vector<4x128xf32>
    %87 = arith.mulf %86, %85 : vector<4x128xf32>
    %88 = arith.mulf %87, %85 : vector<4x128xf32>
    %89 = arith.subf %83, %88 : vector<4x128xf32>
    %cst_31 = arith.constant 0.000000e+00 : f32
    %90 = vector.broadcast %cst_31 : f32 to vector<4x128xf32>
    %91 = arith.maximumf %89, %90 : vector<4x128xf32>
    %cst_32 = arith.constant 0.0322580636 : f32
    %92 = vector.broadcast %cst_32 : f32 to vector<4x128xf32>
    %93 = arith.mulf %91, %92 : vector<4x128xf32>
    %94 = math.sqrt %93 : vector<4x128xf32>
    %cst_33 = arith.constant 9.99999997E-7 : f32
    %95 = vector.broadcast %cst_33 : f32 to vector<4x128xf32>
    %96 = arith.addf %94, %95 : vector<4x128xf32>
    %97 = tpu.reciprocal %96 {approx = true} : vector<4x128xf32> -> vector<4x128xf32>
    %98 = arith.mulf %96, %97 : vector<4x128xf32>
    %cst_34 = arith.constant 2.000000e+00 : f32
    %99 = vector.broadcast %cst_34 : f32 to vector<4x128xf32>
    %100 = arith.subf %99, %98 : vector<4x128xf32>
    %101 = arith.mulf %97, %100 : vector<4x128xf32>
    %102 = arith.mulf %96, %101 : vector<4x128xf32>
    %cst_35 = arith.constant 2.000000e+00 : f32
    %103 = vector.broadcast %cst_35 : f32 to vector<4x128xf32>
    %104 = arith.subf %103, %102 : vector<4x128xf32>
    %105 = arith.mulf %101, %104 : vector<4x128xf32>
    %106 = arith.subf %0, %85 : vector<4x128xf32>
    %107 = arith.mulf %106, %105 : vector<4x128xf32>
    %c0_36 = arith.constant 0 : index
    %c0_37 = arith.constant 0 : index
    %108 = vector.load %arg2[%c0_36, %c0_37] : memref<4x128xf32, #tpu.memory_space<vmem>>, vector<4x128xf32>
    tpu.vector_store %arg2[%c0_36, %c0_37], %107 {strides = array<i32>} : memref<4x128xf32, #tpu.memory_space<vmem>>, vector<4x128xf32>,
    return
  }
  func.func @transform_0(%arg0: i32) -> (i32, i32) {
    %c0_i32 = arith.constant 0 : i32
    %c0_i32_0 = arith.constant 0 : i32
    return %arg0, %c0_i32 : i32, i32
  }
  func.func @transform_1(%arg0: i32) -> (i32, i32) {
    %c0_i32 = arith.constant 0 : i32
    %c0_i32_0 = arith.constant 0 : i32
    return %arg0, %c0_i32 : i32, i32
  }
}

</mosaic_0001>

<bundles_post_ra>
// kernel: tpu_custom_call.1
= control target key start
LH: loop header
LB: loop body
LE: loop exit
PB: predicated region body
PF: predicated region fallthrough
CT: control target
= control target key end

     0   :  { %6 = vsyncpa [#allocation3], 0  ;;  %s254_s0 = inlined_call_operand.hbm [shape: f32[4,128], index: 0, kind: input, shape index: {}]   ;;  %s255_s1 = inlined_call_operand.hbm [shape: f32[4,128], index: 1, kind: output, shape index: {}]  }
   0x1   :  { %7 = vsyncpa [#allocation4], 0  ;;  %s13_s8 = sshll.u32 %s254_s0, 4  ;;  %s211_s9 = smov [#allocation2]   ;;  %s14_s8 = int_to_ptr.hbm [resolvable:$true] %s13_s8 }
   0x2   :  { %s15_s10 = sshll.u32 %s211_s9, 4  ;;  %s16_s10 = int_to_ptr.vmem [resolvable:$true] %s15_s10 }
   0x3   :  { %18 = dma.hbm_to_vmem [thread:$0]  %s14_s8, 64, %s16_s10, [#allocation3]  }
   0x4   :  { %207 = dma.done.wait [#allocation3], 64  }
   0x5   :  { %208 = vsyncadd [#allocation3], 4294967232  ;;  %v236_v0 = vld [vmem:[#allocation2] sm:$0xf]  ;;  %s212_s11 = smov 127   ;;  %s213_s12 = smov 1   ;;  %v24_v2 = vlaneseq }
   0x6   :  { %26 = vrot.lane.b32.xlu0 %v236_v0, %s212_s11  ;;  %v66_v1 = vmul.f32 %v236_v0, %v236_v0  ;;  %s214_s0 = smov 126   ;;  %s215_s13 = smov 2  }
   0x7   :  { %v242_v3 = vand.u32 127, %v24_v2  ;;  %s216_s14 = smov 124   ;;  %s217_s15 = smov 4  }
   0x8   :  { %67 = vrot.lane.b32.xlu1 %v66_v1, %s212_s11  ;;  %s218_s16 = smov 8   ;;  %s219_s17 = smov 120  }
   0x9   :  { %v30_v6 = vand.u32 1, %v242_v3  ;;  %v38_v14 = vand.u32 2, %v242_v3  ;;  %v46_v22 = vand.u32 4, %v242_v3  ;;  %v54_v31 = vand.u32 8, %v242_v3  ;;  %s220_s18 = smov 16   ;;  %s221_s19 = smov 112  }
   0xa   :  { %v62_v40 = vand.u32 16, %v242_v3  ;;  %s222_s20 = smov [#allocation5]   ;;  %s133_s24 = sshll.u32 %s255_s1, 4  ;;  %s134_s24 = int_to_ptr.hbm [resolvable:$true] %s133_s24 }
   0xb   :  { %vm31_vm0 = vcmp.eq.s32.totalorder %v30_v6, 0  ;;  %vm39_vm1 = vcmp.eq.s32.totalorder %v38_v14, 0  ;;  %vm47_vm2 = vcmp.eq.s32.totalorder %v46_v22, 0  ;;  %vm55_vm3 = vcmp.eq.s32.totalorder %v54_v31, 0  ;;  %s131_s21 = sshll.u32 %s222_s20, 4  ;;  %s132_s21 = int_to_ptr.vmem [resolvable:$true] %s131_s21 }
   0xc   :  { %vm63_vm4 = vcmp.eq.s32.totalorder %v62_v40, 0 }
   0xe   :  { %28 = vrot.lane.b32.xlu0 %v236_v0, %s213_s12 }
  0x10   :  { %69 = vrot.lane.b32.xlu1 %v66_v1, %s213_s12 }
  0x78   :  { %v27_v4 = vpop.permute.xlu0 %26 }
  0x7a   :  { %v68_v5 = vpop.permute.xlu1 %67 }
  0x80   :  { %v29_v7 = vpop.permute.xlu0 %28 }
  0x81   :  { %v32_v8 = vsel %vm31_vm0, %v27_v4, %v29_v7 }
  0x82   :  { %v33_v9 = vadd.f32 %v32_v8, %v236_v0  ;;  %v70_v10 = vpop.permute.xlu1 %69 }
  0x83   :  { %v71_v11 = vsel %vm31_vm0, %v68_v5, %v70_v10 }
  0x84   :  { %v72_v12 = vadd.f32 %v71_v11, %v66_v1  ;;  %34 = vrot.lane.b32.xlu2 %v33_v9, %s214_s0 }
  0x86   :  { %75 = vrot.lane.b32.xlu1 %v72_v12, %s215_s13  ;;  %73 = vrot.lane.b32.xlu0 %v72_v12, %s214_s0 }
  0x8c   :  { %36 = vrot.lane.b32.xlu2 %v33_v9, %s215_s13 }
  0xde   :  { %v35_v13 = vpop.permute.xlu2 %34 }
  0xe6   :  { %v37_v15 = vpop.permute.xlu2 %36 }
  0xe7   :  { %v40_v16 = vsel %vm39_vm1, %v35_v13, %v37_v15 }
  0xe8   :  { %v41_v17 = vadd.f32 %v40_v16, %v33_v9 }
  0xea   :  { %42 = vrot.lane.b32.xlu2 %v41_v17, %s216_s14  ;;  %44 = vrot.lane.b32.xlu0 %v41_v17, %s217_s15 }
  0xf8   :  { %v76_v18 = vpop.permute.xlu1 %75  ;;  %v74_v19 = vpop.permute.xlu0 %73 }
  0xf9   :  { %v77_v20 = vsel %vm39_vm1, %v74_v19, %v76_v18 }
  0xfa   :  { %v78_v21 = vadd.f32 %v77_v20, %v72_v12 }
  0xfc   :  { %81 = vrot.lane.b32.xlu2 %v78_v21, %s217_s15  ;;  %79 = vrot.lane.b32.xlu1 %v78_v21, %s216_s14 }
 0x144   :  { %v43_v23 = vpop.permute.xlu2 %42 }
 0x156   :  { %v82_v27 = vpop.permute.xlu2 %81 }
 0x15c   :  { %v45_v24 = vpop.permute.xlu0 %44 }
 0x15d   :  { %v48_v25 = vsel %vm47_vm2, %v43_v23, %v45_v24 }
 0x15e   :  { %v49_v26 = vadd.f32 %v48_v25, %v41_v17 }
 0x160   :  { %52 = vrot.lane.b32.xlu1 %v49_v26, %s218_s16  ;;  %50 = vrot.lane.b32.xlu0 %v49_v26, %s219_s17 }
 0x16e   :  { %v80_v28 = vpop.permute.xlu1 %79 }
 0x16f   :  { %v83_v29 = vsel %vm47_vm2, %v80_v28, %v82_v27 }
 0x170   :  { %v84_v30 = vadd.f32 %v83_v29, %v78_v21 }
 0x172   :  { %85 = vrot.lane.b32.xlu2 %v84_v30, %s219_s17  ;;  %87 = vrot.lane.b32.xlu0 %v84_v30, %s218_s16 }
 0x1cc   :  { %v86_v36 = vpop.permute.xlu2 %85 }
 0x1d2   :  { %v53_v32 = vpop.permute.xlu1 %52  ;;  %v51_v33 = vpop.permute.xlu0 %50 }
 0x1d3   :  { %v56_v34 = vsel %vm55_vm3, %v51_v33, %v53_v32 }
 0x1d4   :  { %v57_v35 = vadd.f32 %v56_v34, %v49_v26 }
 0x1d6   :  { %60 = vrot.lane.b32.xlu2 %v57_v35, %s220_s18  ;;  %58 = vrot.lane.b32.xlu1 %v57_v35, %s221_s19 }
 0x1e4   :  { %v88_v37 = vpop.permute.xlu0 %87 }
 0x1e5   :  { %v89_v38 = vsel %vm55_vm3, %v86_v36, %v88_v37 }
 0x1e6   :  { %v90_v39 = vadd.f32 %v89_v38, %v84_v30 }
 0x1e8   :  { %93 = vrot.lane.b32.xlu1 %v90_v39, %s220_s18  ;;  %91 = vrot.lane.b32.xlu0 %v90_v39, %s221_s19 }
 0x230   :  { %v61_v42 = vpop.permute.xlu2 %60 }
 0x248   :  { %v59_v41 = vpop.permute.xlu1 %58 }
 0x249   :  { %v64_v43 = vsel %vm63_vm4, %v59_v41, %v61_v42 }
 0x24a   :  { %v65_v44 = vadd.f32 %v64_v43, %v57_v35 }
 0x24c   :  { %v97_v45 = vmul.f32 0.03125, %v65_v44 }
 0x24e   :  { %v98_v46 = vmul.f32 32.0, %v97_v45  ;;  %v123_v10 = vsub.f32 %v236_v0, %v97_v45 }
 0x250   :  { %v99_v50 = vmul.f32 %v98_v46, %v97_v45 }
 0x25a   :  { %v94_v47 = vpop.permute.xlu1 %93  ;;  %v92_v48 = vpop.permute.xlu0 %91 }
 0x25b   :  { %v95_v49 = vsel %vm63_vm4, %v92_v48, %v94_v47 }
 0x25c   :  { %v96_v51 = vadd.f32 %v95_v49, %v90_v39 }
 0x25e   :  { %v100_v52 = vsub.f32 %v96_v51, %v99_v50 }
 0x260   :  { %v101_v53 = vmax.f32 %v100_v52, 0.0 }
 0x262   :  { %v102_v54 = vmul.f32 0.032258064, %v101_v53 }
 0x264   :  { %155 = vrsqrt.f32 %v102_v54  ;;  %vm110_vm5 = vcmp.eq.f32.partialorder %v102_v54, inf  ;;  %v113_v62 = vand.u32 2147483648, %v102_v54  ;;  %vm112_vm6 = vcmp.eq.f32.partialorder %v102_v54, 0.0 }
 0x26a   :  { %v156_v55 = vpop.eup %155 }
 0x26b   :  { %v104_v56 = vmul.f32 %v156_v55, %v102_v54 }
 0x26d   :  { %v105_v57 = vmul.f32 %v156_v55, %v104_v56 }
 0x26f   :  { %v106_v58 = vmul.f32 0.5, %v105_v57 }
 0x271   :  { %v107_v59 = vsub.f32 1.5, %v106_v58 }
 0x273   :  { %v108_v60 = vmul.f32 %v156_v55, %v107_v59 }
 0x275   :  { %v109_v61 = vmul.f32 %v108_v60, %v102_v54 }
 0x277   :  { %v111_v63 = vsel %vm110_vm5, %v102_v54, %v109_v61 }
 0x278   :  { %v114_v1 = vsel %vm112_vm6, %v113_v62, %v111_v63 }
 0x279   :  { %v115_v2 = vadd.f32 1e-06, %v114_v1 }
 0x27b   :  { %157 = vrcp.f32 %v115_v2 }
 0x281   :  { %v158_v3 = vpop.eup %157 }
 0x282   :  { %v117_v4 = vmul.f32 %v158_v3, %v115_v2 }
 0x284   :  { %v118_v5 = vsub.f32 2.0, %v117_v4 }
 0x286   :  { %v119_v6 = vmul.f32 %v158_v3, %v118_v5 }
 0x288   :  { %v120_v7 = vmul.f32 %v119_v6, %v115_v2 }
 0x28a   :  { %v121_v8 = vsub.f32 2.0, %v120_v7 }
 0x28c   :  { %v122_v9 = vmul.f32 %v121_v8, %v119_v6 }
 0x28e   :  { %v124_v11 = vmul.f32 %v123_v10, %v122_v9 }
 0x290   :  { %125 = vst [vmem:[#allocation5] sm:$0xf] %v124_v11 }
 0x291   :  { %136 = dma.vmem_to_hbm [thread:$0]  %s132_s21, 64, %s134_s24, [#allocation4]  }
 0x292   :  { %209 = dma.done.wait [#allocation4], 64  }
 0x293   :  { %210 = vsyncadd [#allocation4], 4294967232 }
 0x294   :  { %141 = vsyncpa [#allocation3], 1 }
 0x295   :  { %142 = vsyncpa [#allocation4], 1 }

</bundles_post_ra>
